<compile_context>
chip_gen: v7x
topology: tpu7x:2x2x1
jax: 0.10.0
libtpu: 0.0.40
codegen_flags: <defaults>
</compile_context>

<pallas_src>
import functools

import jax
import jax.numpy as jnp
import numpy as np
from jax import lax
from jax.experimental import pallas as pl
from jax.experimental.pallas import tpu as pltpu

SELU_ALPHA = 1.6732632423543772848170429916717
SELU_SCALE = 1.0507009873554804934193349852946


def _selu(x):
    return SELU_SCALE * jnp.where(x > 0, x, SELU_ALPHA * (jnp.exp(x) - 1.0))


# ----------------------------------------------------------------------------
# Fused kernel: conv(k4,s2,p1) -> [selu -> conv(k3,s1,p1)]*(L-1) -> selu -> +residual
# All activations are channels-major (C_out, m); one matmul per layer.
# ----------------------------------------------------------------------------
def _residual_block_kernel(*refs, num_layers, c_out, ho, wo, residual):
    p0_ref, w0_ref, b0_ref, mask_ref = refs[0], refs[1], refs[2], refs[3]
    layer_refs = refs[4:4 + 2 * (num_layers - 1)]
    out_ref = refs[4 + 2 * (num_layers - 1)]

    m = ho * wo
    cd = w0_ref.dtype                         # MXU feed dtype (f32 default, bf16 opt.)

    # ---- layer 0: single K = 16*C_in dot (im2col patch prepared in the wrapper).
    acc = jnp.dot(w0_ref[...], p0_ref[0],     # (c_out, K0) @ (K0, m)
                  preferred_element_type=jnp.float32)
    acc = acc + b0_ref[...]                   # (c_out, m) f32, bias broadcast on lanes
    resid = acc                               # residual = pre-activation conv0 output
    h = _selu(acc)

    # ---- layers 1..L-1: 3x3 / s1 / p1 conv as ONE K = 9*C_out dot per layer.
    # Taps are lane shifts of h (flat spatial index l = oh*wo + ow; neighbor = l + d
    # with d = di*wo + dj).  Out-of-bounds neighbors are killed by precomputed 0/1
    # edge masks, so wrap-around/zero-extension artifacts never reach valid lanes.
    masks = mask_ref[...]                     # (9, 1, m) in cd, values {0, 1}
    zpad = jnp.zeros((c_out, wo + 1), cd)     # lane extension, hoisted out of the loop
    for l in range(num_layers - 1):
        w_ref, b_ref = layer_refs[2 * l], layer_refs[2 * l + 1]
        hext = jnp.concatenate([zpad, h.astype(cd), zpad], axis=1)  # (c_out, m+2*(wo+1))
        taps = []
        t = 0
        for di in (-1, 0, 1):
            for dj in (-1, 0, 1):
                start = (wo + 1) + di * wo + dj
                tap = hext[:, start:start + m]            # tap[:, l] = h[:, l + d]
                if (di, dj) != (0, 0):
                    tap = tap * masks[t]                  # (1, m) edge mask
                taps.append(tap)
                t += 1
        patch = jnp.concatenate(taps, axis=0)             # (9*c_out, m)
        acc = jnp.dot(w_ref[...], patch, preferred_element_type=jnp.float32)
        acc = acc + b_ref[...]
        h = _selu(acc)

    out = h + resid if residual else h
    out_ref[...] = out[None].astype(out_ref.dtype)        # (1, c_out, m), channels-major


# ----------------------------------------------------------------------------
# One-time weight preparation (hoisted out of the forward pass)
# ----------------------------------------------------------------------------
def prepare_params(torch_params, num_layers=3, compute_dtype=jnp.float32):
    """PyTorch-layout weights -> transposed, kernel-ready matrices (run once)."""
    w0 = torch_params["w0"]                                # (C_out, C_in, 4, 4)
    c_out, c_in = w0.shape[0], w0.shape[1]
    # column index k = (i*4 + j)*C_in + c  (matches the wrapper-built im2col patch)
    w0t = jnp.transpose(w0, (0, 2, 3, 1)).reshape(c_out, 16 * c_in)
    prepped = {
        "w0": w0t.astype(compute_dtype),
        "b0": torch_params["b0"].reshape(c_out, 1).astype(jnp.float32),
    }
    for l in range(1, num_layers):
        w = torch_params[f"w{l}"]                          # (C_out, C_out, 3, 3)
        # column index k = (i*3 + j)*C_out + c  (matches in-kernel tap ordering)
        prepped[f"w{l}"] = (jnp.transpose(w, (0, 2, 3, 1))
                            .reshape(c_out, 9 * c_out).astype(compute_dtype))
        prepped[f"b{l}"] = torch_params[f"b{l}"].reshape(c_out, 1).astype(jnp.float32)
    return prepped


def _layer0_patch(x_nchw, compute_dtype):
    """Layer-0 im2col patch^T: (B, 16*C_in, ho*wo), tap order (i*4+j), channel-minor."""
    b, c, hh, ww = x_nchw.shape
    ho, wo = (hh + 2 - 4) // 2 + 1, (ww + 2 - 4) // 2 + 1
    xp = jnp.pad(x_nchw, ((0, 0), (0, 0), (1, 1), (1, 1)))          # Conv2d padding=1
    taps = []
    for i in range(4):
        for j in range(4):
            taps.append(xp[:, :, i:i + 2 * ho - 1:2, j:j + 2 * wo - 1:2])  # (B,C,ho,wo)
    patch = jnp.concatenate(taps, axis=1)                            # (B, 16*C, ho, wo)
    return patch.reshape(b, 16 * c, ho * wo).astype(compute_dtype), ho, wo


def _edge_masks(ho, wo, compute_dtype):
    """Static 0/1 masks killing out-of-bounds 3x3 neighbors; shape (9, 1, ho*wo)."""
    m = ho * wo
    row = np.arange(m) // wo
    col = np.arange(m) % wo
    masks = []
    for di in (-1, 0, 1):
        for dj in (-1, 0, 1):
            ok = np.ones(m, dtype=bool)
            if di == -1:
                ok &= row > 0
            if di == 1:
                ok &= row < ho - 1
            if dj == -1:
                ok &= col > 0
            if dj == 1:
                ok &= col < wo - 1
            masks.append(ok)
    arr = np.stack(masks).astype(np.float32).reshape(9, 1, m)
    return jnp.asarray(arr, dtype=compute_dtype)


# ----------------------------------------------------------------------------
# Forward wrapper (single pallas_call, grid over batch)
# ----------------------------------------------------------------------------
def residual_block_forward(prepped, x_nchw, *, num_layers=3, residual=True):
    b = x_nchw.shape[0]
    c_out = prepped["w0"].shape[0]
    cd = prepped["w0"].dtype

    patch0, ho, wo = _layer0_patch(x_nchw, cd)
    m = ho * wo
    k0 = patch0.shape[1]
    masks = _edge_masks(ho, wo, cd)

    kernel = functools.partial(
        _residual_block_kernel, num_layers=num_layers, c_out=c_out,
        ho=ho, wo=wo, residual=residual)

    in_specs = [
        pl.BlockSpec((1, k0, m), lambda i: (i, 0, 0)),        # layer-0 im2col patch^T
        pl.BlockSpec((c_out, k0), lambda i: (0, 0)),          # W0^T
        pl.BlockSpec((c_out, 1), lambda i: (0, 0)),           # b0 column
        pl.BlockSpec((9, 1, m), lambda i: (0, 0, 0)),         # edge masks
    ]
    operands = [patch0, prepped["w0"], prepped["b0"], masks]
    for l in range(1, num_layers):
        in_specs += [pl.BlockSpec((c_out, 9 * c_out), lambda i: (0, 0)),
                     pl.BlockSpec((c_out, 1), lambda i: (0, 0))]
        operands += [prepped[f"w{l}"], prepped[f"b{l}"]]

    out = pl.pallas_call(
        kernel,
        out_shape=jax.ShapeDtypeStruct((b, c_out, m), jnp.float32),
        grid=(b,),                                            # one program per batch item
        in_specs=in_specs,
        out_specs=pl.BlockSpec((1, c_out, m), lambda i: (i, 0, 0)),
        compiler_params=pltpu.CompilerParams(
            dimension_semantics=("parallel",)),               # v7x: both TCs busy
    )(*operands)

    # Output is already channels-major: just split the trailing dim (no transpose).
    return out.reshape(b, c_out, ho, wo)


# ----------------------------------------------------------------------------
# Pure-JAX reference (PyTorch semantics) for correctness checking
# ----------------------------------------------------------------------------
def _reference_forward(torch_params, x_nchw, *, num_layers=3, residual=True):
    dn = ("NCHW", "OIHW", "NCHW")
    h = lax.conv_general_dilated(x_nchw, torch_params["w0"], (2, 2),
                                 ((1, 1), (1, 1)), dimension_numbers=dn)
    h = h + torch_params["b0"][None, :, None, None]
    resid = h
    h = jax.nn.selu(h)
    for l in range(1, num_layers):
        h = lax.conv_general_dilated(h, torch_params[f"w{l}"], (1, 1),
                                     ((1, 1), (1, 1)), dimension_numbers=dn)
        h = h + torch_params[f"b{l}"][None, :, None, None]
        h = jax.nn.selu(h)
    return h + resid if residual else h


if __name__ == "__main__":
    B, C_IN, H, W = 2, 4, 16, 16
    C_OUT = 16
    NUM_LAYERS = 3

    key = jax.random.PRNGKey(0)
    keys = jax.random.split(key, 2 * NUM_LAYERS + 1)
    torch_params = {
        "w0": jnp.sqrt(2.0 / (C_IN * 16)) *
              jax.random.normal(keys[0], (C_OUT, C_IN, 4, 4), jnp.float32),
        "b0": 0.1 * jax.random.normal(keys[1], (C_OUT,), jnp.float32),
    }
    for l in range(1, NUM_LAYERS):
        torch_params[f"w{l}"] = jnp.sqrt(2.0 / (C_OUT * 9)) * jax.random.normal(
            keys[2 * l], (C_OUT, C_OUT, 3, 3), jnp.float32)
        torch_params[f"b{l}"] = 0.1 * jax.random.normal(keys[2 * l + 1], (C_OUT,),
                                                        jnp.float32)
    x = jax.random.normal(keys[-1], (B, C_IN, H, W), jnp.float32)

    ref = _reference_forward(torch_params, x, num_layers=NUM_LAYERS, residual=True)

    fwd = jax.jit(functools.partial(residual_block_forward,
                                    num_layers=NUM_LAYERS, residual=True))

    # --- f32 MXU feed: matches the f32 PyTorch reference closely.
    prepped_f32 = prepare_params(torch_params, num_layers=NUM_LAYERS,
                                 compute_dtype=jnp.float32)
    out_f32 = fwd(prepped_f32, x)
    jax.block_until_ready(out_f32)
    assert out_f32.shape == (B, C_OUT, H // 2, W // 2), out_f32.shape
    err_f32 = float(jnp.max(jnp.abs(out_f32 - ref)))
    assert err_f32 < 2e-2, f"f32 max abs err vs reference: {err_f32}"

    # --- bf16 MXU feed (recommended on v6e/v7x); f32 accumulation + f32 epilogue.
    prepped_bf16 = prepare_params(torch_params, num_layers=NUM_LAYERS,
                                  compute_dtype=jnp.bfloat16)
    out_bf16 = fwd(prepped_bf16, x)
    jax.block_until_ready(out_bf16)
    err_bf16 = float(jnp.max(jnp.abs(out_bf16 - ref)))
    assert err_bf16 < 2.5e-1, f"bf16 max abs err vs reference: {err_bf16}"

    print("KERNEL_OK")
</pallas_src>

<mosaic_0001>
module attributes {stable_mosaic.version = 11 : i64} {
  func.func @_residual_block_kernel(%arg0: i32, %arg1: memref<1x64x64xf32, #tpu.memory_space<vmem>>, %arg2: memref<16x64xf32, #tpu.memory_space<vmem>>, %arg3: memref<16x1xf32, #tpu.memory_space<vmem>>, %arg4: memref<9x1x64xf32, #tpu.memory_space<vmem>>, %arg5: memref<16x144xf32, #tpu.memory_space<vmem>>, %arg6: memref<16x1xf32, #tpu.memory_space<vmem>>, %arg7: memref<16x144xf32, #tpu.memory_space<vmem>>, %arg8: memref<16x1xf32, #tpu.memory_space<vmem>>, %arg9: memref<1x16x64xf32, #tpu.memory_space<vmem>>) attributes {dimension_semantics = [#tpu.dimension_semantics<parallel>], iteration_bounds = array<i64: 2>, scalar_prefetch = 0 : i64, scratch_operands = 0 : i64, tpu.core_type = #tpu.core_type<tc>, window_params = [{transform_indices = @transform_0, window_bounds = array<i64: 1, 64, 64>}, {pipeline_mode = #tpu.pipeline_mode<synchronous>, transform_indices = @transform_1, window_bounds = array<i64: 16, 64>}, {pipeline_mode = #tpu.pipeline_mode<synchronous>, transform_indices = @transform_2, window_bounds = array<i64: 16, 1>}, {pipeline_mode = #tpu.pipeline_mode<synchronous>, transform_indices = @transform_3, window_bounds = array<i64: 9, 1, 64>}, {pipeline_mode = #tpu.pipeline_mode<synchronous>, transform_indices = @transform_4, window_bounds = array<i64: 16, 144>}, {pipeline_mode = #tpu.pipeline_mode<synchronous>, transform_indices = @transform_5, window_bounds = array<i64: 16, 1>}, {pipeline_mode = #tpu.pipeline_mode<synchronous>, transform_indices = @transform_6, window_bounds = array<i64: 16, 144>}, {pipeline_mode = #tpu.pipeline_mode<synchronous>, transform_indices = @transform_7, window_bounds = array<i64: 16, 1>}, {transform_indices = @transform_8, window_bounds = array<i64: 1, 16, 64>}]} {
    %c0 = arith.constant 0 : index
    %c0_0 = arith.constant 0 : index
    %0 = vector.load %arg2[%c0, %c0_0] : memref<16x64xf32, #tpu.memory_space<vmem>>, vector<16x64xf32>
    %c0_1 = arith.constant 0 : index
    %c0_2 = arith.constant 0 : index
    %c0_3 = arith.constant 0 : index
    %1 = vector.load %arg1[%c0_1, %c0_2, %c0_3] : memref<1x64x64xf32, #tpu.memory_space<vmem>>, vector<1x64x64xf32>
    %2 = vector.shape_cast %1 : vector<1x64x64xf32> to vector<64x64xf32>
    %cst = arith.constant dense<0.000000e+00> : vector<16x64xf32>
    %3 = tpu.matmul %0, %2, %cst {dimension_numbers = #tpu.dot_dimension_numbers<[1], [0], [0], [1], [0, 0, 1, 1], [], []>} : vector<16x64xf32>, vector<64x64xf32>, vector<16x64xf32> -> vector<16x64xf32>
    %c0_4 = arith.constant 0 : index
    %c0_5 = arith.constant 0 : index
    %4 = vector.load %arg3[%c0_4, %c0_5] : memref<16x1xf32, #tpu.memory_space<vmem>>, vector<16x1xf32>
    %5 = vector.broadcast %4 : vector<16x1xf32> to vector<16x64xf32>
    %6 = arith.addf %3, %5 : vector<16x64xf32>
    %cst_6 = arith.constant 0.000000e+00 : f32
    %7 = vector.broadcast %cst_6 : f32 to vector<16x64xf32>
    %8 = arith.cmpf ogt, %6, %7 : vector<16x64xf32>
    %9 = math.exp %6 : vector<16x64xf32>
    %cst_7 = arith.constant 1.000000e+00 : f32
    %10 = vector.broadcast %cst_7 : f32 to vector<16x64xf32>
    %11 = arith.subf %9, %10 : vector<16x64xf32>
    %cst_8 = arith.constant 1.67326319 : f32
    %12 = vector.broadcast %cst_8 : f32 to vector<16x64xf32>
    %13 = arith.mulf %12, %11 : vector<16x64xf32>
    %14 = arith.select %8, %6, %13 : vector<16x64xi1>, vector<16x64xf32>
    %cst_9 = arith.constant 1.05070102 : f32
    %15 = vector.broadcast %cst_9 : f32 to vector<16x64xf32>
    %16 = arith.mulf %15, %14 : vector<16x64xf32>
    %c0_10 = arith.constant 0 : index
    %c0_11 = arith.constant 0 : index
    %c0_12 = arith.constant 0 : index
    %17 = vector.load %arg4[%c0_10, %c0_11, %c0_12] : memref<9x1x64xf32, #tpu.memory_space<vmem>>, vector<9x1x64xf32>
    %cst_13 = arith.constant 0.000000e+00 : f32
    %18 = vector.broadcast %cst_13 : f32 to vector<16x9xf32>
    %19 = tpu.concatenate %18, %16, %18 in 1 : vector<16x9xf32>, vector<16x64xf32>, vector<16x9xf32> -> vector<16x82xf32>
    %20 = vector.extract_strided_slice %19 {offsets = [0, 0], sizes = [16, 64], strides = [1, 1]} : vector<16x82xf32> to vector<16x64xf32>
    %21 = vector.extract_strided_slice %17 {offsets = [0, 0, 0], sizes = [1, 1, 64], strides = [1, 1, 1]} : vector<9x1x64xf32> to vector<1x1x64xf32>
    %22 = vector.shape_cast %21 : vector<1x1x64xf32> to vector<1x64xf32>
    %23 = vector.broadcast %22 : vector<1x64xf32> to vector<16x64xf32>
    %24 = arith.mulf %20, %23 : vector<16x64xf32>
    %25 = vector.extract_strided_slice %19 {offsets = [0, 1], sizes = [16, 64], strides = [1, 1]} : vector<16x82xf32> to vector<16x64xf32>
    %26 = vector.extract_strided_slice %17 {offsets = [1, 0, 0], sizes = [1, 1, 64], strides = [1, 1, 1]} : vector<9x1x64xf32> to vector<1x1x64xf32>
    %27 = vector.shape_cast %26 : vector<1x1x64xf32> to vector<1x64xf32>
    %28 = vector.broadcast %27 : vector<1x64xf32> to vector<16x64xf32>
    %29 = arith.mulf %25, %28 : vector<16x64xf32>
    %30 = vector.extract_strided_slice %19 {offsets = [0, 2], sizes = [16, 64], strides = [1, 1]} : vector<16x82xf32> to vector<16x64xf32>
    %31 = vector.extract_strided_slice %17 {offsets = [2, 0, 0], sizes = [1, 1, 64], strides = [1, 1, 1]} : vector<9x1x64xf32> to vector<1x1x64xf32>
    %32 = vector.shape_cast %31 : vector<1x1x64xf32> to vector<1x64xf32>
    %33 = vector.broadcast %32 : vector<1x64xf32> to vector<16x64xf32>
    %34 = arith.mulf %30, %33 : vector<16x64xf32>
    %35 = vector.extract_strided_slice %19 {offsets = [0, 8], sizes = [16, 64], strides = [1, 1]} : vector<16x82xf32> to vector<16x64xf32>
    %36 = vector.extract_strided_slice %17 {offsets = [3, 0, 0], sizes = [1, 1, 64], strides = [1, 1, 1]} : vector<9x1x64xf32> to vector<1x1x64xf32>
    %37 = vector.shape_cast %36 : vector<1x1x64xf32> to vector<1x64xf32>
    %38 = vector.broadcast %37 : vector<1x64xf32> to vector<16x64xf32>
    %39 = arith.mulf %35, %38 : vector<16x64xf32>
    %40 = vector.extract_strided_slice %19 {offsets = [0, 9], sizes = [16, 64], strides = [1, 1]} : vector<16x82xf32> to vector<16x64xf32>
    %41 = vector.extract_strided_slice %19 {offsets = [0, 10], sizes = [16, 64], strides = [1, 1]} : vector<16x82xf32> to vector<16x64xf32>
    %42 = vector.extract_strided_slice %17 {offsets = [5, 0, 0], sizes = [1, 1, 64], strides = [1, 1, 1]} : vector<9x1x64xf32> to vector<1x1x64xf32>
    %43 = vector.shape_cast %42 : vector<1x1x64xf32> to vector<1x64xf32>
    %44 = vector.broadcast %43 : vector<1x64xf32> to vector<16x64xf32>
    %45 = arith.mulf %41, %44 : vector<16x64xf32>
    %46 = vector.extract_strided_slice %19 {offsets = [0, 16], sizes = [16, 64], strides = [1, 1]} : vector<16x82xf32> to vector<16x64xf32>
    %47 = vector.extract_strided_slice %17 {offsets = [6, 0, 0], sizes = [1, 1, 64], strides = [1, 1, 1]} : vector<9x1x64xf32> to vector<1x1x64xf32>
    %48 = vector.shape_cast %47 : vector<1x1x64xf32> to vector<1x64xf32>
    %49 = vector.broadcast %48 : vector<1x64xf32> to vector<16x64xf32>
    %50 = arith.mulf %46, %49 : vector<16x64xf32>
    %51 = vector.extract_strided_slice %19 {offsets = [0, 17], sizes = [16, 64], strides = [1, 1]} : vector<16x82xf32> to vector<16x64xf32>
    %52 = vector.extract_strided_slice %17 {offsets = [7, 0, 0], sizes = [1, 1, 64], strides = [1, 1, 1]} : vector<9x1x64xf32> to vector<1x1x64xf32>
    %53 = vector.shape_cast %52 : vector<1x1x64xf32> to vector<1x64xf32>
    %54 = vector.broadcast %53 : vector<1x64xf32> to vector<16x64xf32>
    %55 = arith.mulf %51, %54 : vector<16x64xf32>
    %56 = vector.extract_strided_slice %19 {offsets = [0, 18], sizes = [16, 64], strides = [1, 1]} : vector<16x82xf32> to vector<16x64xf32>
    %57 = vector.extract_strided_slice %17 {offsets = [8, 0, 0], sizes = [1, 1, 64], strides = [1, 1, 1]} : vector<9x1x64xf32> to vector<1x1x64xf32>
    %58 = vector.shape_cast %57 : vector<1x1x64xf32> to vector<1x64xf32>
    %59 = vector.broadcast %58 : vector<1x64xf32> to vector<16x64xf32>
    %60 = arith.mulf %56, %59 : vector<16x64xf32>
    %61 = tpu.concatenate %24, %29, %34, %39, %40, %45, %50, %55, %60 in 0 : vector<16x64xf32>, vector<16x64xf32>, vector<16x64xf32>, vector<16x64xf32>, vector<16x64xf32>, vector<16x64xf32>, vector<16x64xf32>, vector<16x64xf32>, vector<16x64xf32> -> vector<144x64xf32>
    %c0_14 = arith.constant 0 : index
    %c0_15 = arith.constant 0 : index
    %62 = vector.load %arg5[%c0_14, %c0_15] : memref<16x144xf32, #tpu.memory_space<vmem>>, vector<16x144xf32>
    %cst_16 = arith.constant dense<0.000000e+00> : vector<16x64xf32>
    %63 = tpu.matmul %62, %61, %cst_16 {dimension_numbers = #tpu.dot_dimension_numbers<[1], [0], [0], [1], [0, 0, 1, 1], [], []>} : vector<16x144xf32>, vector<144x64xf32>, vector<16x64xf32> -> vector<16x64xf32>
    %c0_17 = arith.constant 0 : index
    %c0_18 = arith.constant 0 : index
    %64 = vector.load %arg6[%c0_17, %c0_18] : memref<16x1xf32, #tpu.memory_space<vmem>>, vector<16x1xf32>
    %65 = vector.broadcast %64 : vector<16x1xf32> to vector<16x64xf32>
    %66 = arith.addf %63, %65 : vector<16x64xf32>
    %cst_19 = arith.constant 0.000000e+00 : f32
    %67 = vector.broadcast %cst_19 : f32 to vector<16x64xf32>
    %68 = arith.cmpf ogt, %66, %67 : vector<16x64xf32>
    %69 = math.exp %66 : vector<16x64xf32>
    %cst_20 = arith.constant 1.000000e+00 : f32
    %70 = vector.broadcast %cst_20 : f32 to vector<16x64xf32>
    %71 = arith.subf %69, %70 : vector<16x64xf32>
    %cst_21 = arith.constant 1.67326319 : f32
    %72 = vector.broadcast %cst_21 : f32 to vector<16x64xf32>
    %73 = arith.mulf %72, %71 : vector<16x64xf32>
    %74 = arith.select %68, %66, %73 : vector<16x64xi1>, vector<16x64xf32>
    %cst_22 = arith.constant 1.05070102 : f32
    %75 = vector.broadcast %cst_22 : f32 to vector<16x64xf32>
    %76 = arith.mulf %75, %74 : vector<16x64xf32>
    %77 = tpu.concatenate %18, %76, %18 in 1 : vector<16x9xf32>, vector<16x64xf32>, vector<16x9xf32> -> vector<16x82xf32>
    %78 = vector.extract_strided_slice %77 {offsets = [0, 0], sizes = [16, 64], strides = [1, 1]} : vector<16x82xf32> to vector<16x64xf32>
    %79 = vector.extract_strided_slice %17 {offsets = [0, 0, 0], sizes = [1, 1, 64], strides = [1, 1, 1]} : vector<9x1x64xf32> to vector<1x1x64xf32>
    %80 = vector.shape_cast %79 : vector<1x1x64xf32> to vector<1x64xf32>
    %81 = vector.broadcast %80 : vector<1x64xf32> to vector<16x64xf32>
    %82 = arith.mulf %78, %81 : vector<16x64xf32>
    %83 = vector.extract_strided_slice %77 {offsets = [0, 1], sizes = [16, 64], strides = [1, 1]} : vector<16x82xf32> to vector<16x64xf32>
    %84 = vector.extract_strided_slice %17 {offsets = [1, 0, 0], sizes = [1, 1, 64], strides = [1, 1, 1]} : vector<9x1x64xf32> to vector<1x1x64xf32>
    %85 = vector.shape_cast %84 : vector<1x1x64xf32> to vector<1x64xf32>
    %86 = vector.broadcast %85 : vector<1x64xf32> to vector<16x64xf32>
    %87 = arith.mulf %83, %86 : vector<16x64xf32>
    %88 = vector.extract_strided_slice %77 {offsets = [0, 2], sizes = [16, 64], strides = [1, 1]} : vector<16x82xf32> to vector<16x64xf32>
    %89 = vector.extract_strided_slice %17 {offsets = [2, 0, 0], sizes = [1, 1, 64], strides = [1, 1, 1]} : vector<9x1x64xf32> to vector<1x1x64xf32>
    %90 = vector.shape_cast %89 : vector<1x1x64xf32> to vector<1x64xf32>
    %91 = vector.broadcast %90 : vector<1x64xf32> to vector<16x64xf32>
    %92 = arith.mulf %88, %91 : vector<16x64xf32>
    %93 = vector.extract_strided_slice %77 {offsets = [0, 8], sizes = [16, 64], strides = [1, 1]} : vector<16x82xf32> to vector<16x64xf32>
    %94 = vector.extract_strided_slice %17 {offsets = [3, 0, 0], sizes = [1, 1, 64], strides = [1, 1, 1]} : vector<9x1x64xf32> to vector<1x1x64xf32>
    %95 = vector.shape_cast %94 : vector<1x1x64xf32> to vector<1x64xf32>
    %96 = vector.broadcast %95 : vector<1x64xf32> to vector<16x64xf32>
    %97 = arith.mulf %93, %96 : vector<16x64xf32>
    %98 = vector.extract_strided_slice %77 {offsets = [0, 9], sizes = [16, 64], strides = [1, 1]} : vector<16x82xf32> to vector<16x64xf32>
    %99 = vector.extract_strided_slice %77 {offsets = [0, 10], sizes = [16, 64], strides = [1, 1]} : vector<16x82xf32> to vector<16x64xf32>
    %100 = vector.extract_strided_slice %17 {offsets = [5, 0, 0], sizes = [1, 1, 64], strides = [1, 1, 1]} : vector<9x1x64xf32> to vector<1x1x64xf32>
    %101 = vector.shape_cast %100 : vector<1x1x64xf32> to vector<1x64xf32>
    %102 = vector.broadcast %101 : vector<1x64xf32> to vector<16x64xf32>
    %103 = arith.mulf %99, %102 : vector<16x64xf32>
    %104 = vector.extract_strided_slice %77 {offsets = [0, 16], sizes = [16, 64], strides = [1, 1]} : vector<16x82xf32> to vector<16x64xf32>
    %105 = vector.extract_strided_slice %17 {offsets = [6, 0, 0], sizes = [1, 1, 64], strides = [1, 1, 1]} : vector<9x1x64xf32> to vector<1x1x64xf32>
    %106 = vector.shape_cast %105 : vector<1x1x64xf32> to vector<1x64xf32>
    %107 = vector.broadcast %106 : vector<1x64xf32> to vector<16x64xf32>
    %108 = arith.mulf %104, %107 : vector<16x64xf32>
    %109 = vector.extract_strided_slice %77 {offsets = [0, 17], sizes = [16, 64], strides = [1, 1]} : vector<16x82xf32> to vector<16x64xf32>
    %110 = vector.extract_strided_slice %17 {offsets = [7, 0, 0], sizes = [1, 1, 64], strides = [1, 1, 1]} : vector<9x1x64xf32> to vector<1x1x64xf32>
    %111 = vector.shape_cast %110 : vector<1x1x64xf32> to vector<1x64xf32>
    %112 = vector.broadcast %111 : vector<1x64xf32> to vector<16x64xf32>
    %113 = arith.mulf %109, %112 : vector<16x64xf32>
    %114 = vector.extract_strided_slice %77 {offsets = [0, 18], sizes = [16, 64], strides = [1, 1]} : vector<16x82xf32> to vector<16x64xf32>
    %115 = vector.extract_strided_slice %17 {offsets = [8, 0, 0], sizes = [1, 1, 64], strides = [1, 1, 1]} : vector<9x1x64xf32> to vector<1x1x64xf32>
    %116 = vector.shape_cast %115 : vector<1x1x64xf32> to vector<1x64xf32>
    %117 = vector.broadcast %116 : vector<1x64xf32> to vector<16x64xf32>
    %118 = arith.mulf %114, %117 : vector<16x64xf32>
    %119 = tpu.concatenate %82, %87, %92, %97, %98, %103, %108, %113, %118 in 0 : vector<16x64xf32>, vector<16x64xf32>, vector<16x64xf32>, vector<16x64xf32>, vector<16x64xf32>, vector<16x64xf32>, vector<16x64xf32>, vector<16x64xf32>, vector<16x64xf32> -> vector<144x64xf32>
    %c0_23 = arith.constant 0 : index
    %c0_24 = arith.constant 0 : index
    %120 = vector.load %arg7[%c0_23, %c0_24] : memref<16x144xf32, #tpu.memory_space<vmem>>, vector<16x144xf32>
    %cst_25 = arith.constant dense<0.000000e+00> : vector<16x64xf32>
    %121 = tpu.matmul %120, %119, %cst_25 {dimension_numbers = #tpu.dot_dimension_numbers<[1], [0], [0], [1], [0, 0, 1, 1], [], []>} : vector<16x144xf32>, vector<144x64xf32>, vector<16x64xf32> -> vector<16x64xf32>
    %c0_26 = arith.constant 0 : index
    %c0_27 = arith.constant 0 : index
    %122 = vector.load %arg8[%c0_26, %c0_27] : memref<16x1xf32, #tpu.memory_space<vmem>>, vector<16x1xf32>
    %123 = vector.broadcast %122 : vector<16x1xf32> to vector<16x64xf32>
    %124 = arith.addf %121, %123 : vector<16x64xf32>
    %cst_28 = arith.constant 0.000000e+00 : f32
    %125 = vector.broadcast %cst_28 : f32 to vector<16x64xf32>
    %126 = arith.cmpf ogt, %124, %125 : vector<16x64xf32>
    %127 = math.exp %124 : vector<16x64xf32>
    %cst_29 = arith.constant 1.000000e+00 : f32
    %128 = vector.broadcast %cst_29 : f32 to vector<16x64xf32>
    %129 = arith.subf %127, %128 : vector<16x64xf32>
    %cst_30 = arith.constant 1.67326319 : f32
    %130 = vector.broadcast %cst_30 : f32 to vector<16x64xf32>
    %131 = arith.mulf %130, %129 : vector<16x64xf32>
    %132 = arith.select %126, %124, %131 : vector<16x64xi1>, vector<16x64xf32>
    %cst_31 = arith.constant 1.05070102 : f32
    %133 = vector.broadcast %cst_31 : f32 to vector<16x64xf32>
    %134 = arith.mulf %133, %132 : vector<16x64xf32>
    %135 = arith.addf %134, %6 : vector<16x64xf32>
    %136 = vector.shape_cast %135 : vector<16x64xf32> to vector<1x16x64xf32>
    %c0_32 = arith.constant 0 : index
    %c0_33 = arith.constant 0 : index
    %c0_34 = arith.constant 0 : index
    %137 = vector.load %arg9[%c0_32, %c0_33, %c0_34] : memref<1x16x64xf32, #tpu.memory_space<vmem>>, vector<1x16x64xf32>
    tpu.vector_store %arg9[%c0_32, %c0_33, %c0_34], %136 {strides = array<i32>} : memref<1x16x64xf32, #tpu.memory_space<vmem>>, vector<1x16x64xf32>,
    return
  }
  func.func @transform_0(%arg0: i32) -> (i32, i32, i32) {
    %c0_i32 = arith.constant 0 : i32
    %c0_i32_0 = arith.constant 0 : i32
    %c0_i32_1 = arith.constant 0 : i32
    return %arg0, %c0_i32, %c0_i32_0 : i32, i32, i32
  }
  func.func @transform_1(%arg0: i32) -> (i32, i32) {
    %c0_i32 = arith.constant 0 : i32
    %c0_i32_0 = arith.constant 0 : i32
    %c0_i32_1 = arith.constant 0 : i32
    return %c0_i32, %c0_i32_0 : i32, i32
  }
  func.func @transform_2(%arg0: i32) -> (i32, i32) {
    %c0_i32 = arith.constant 0 : i32
    %c0_i32_0 = arith.constant 0 : i32
    %c0_i32_1 = arith.constant 0 : i32
    return %c0_i32, %c0_i32_0 : i32, i32
  }
  func.func @transform_3(%arg0: i32) -> (i32, i32, i32) {
    %c0_i32 = arith.constant 0 : i32
    %c0_i32_0 = arith.constant 0 : i32
    %c0_i32_1 = arith.constant 0 : i32
    %c0_i32_2 = arith.constant 0 : i32
    return %c0_i32, %c0_i32_0, %c0_i32_1 : i32, i32, i32
  }
  func.func @transform_4(%arg0: i32) -> (i32, i32) {
    %c0_i32 = arith.constant 0 : i32
    %c0_i32_0 = arith.constant 0 : i32
    %c0_i32_1 = arith.constant 0 : i32
    return %c0_i32, %c0_i32_0 : i32, i32
  }
  func.func @transform_5(%arg0: i32) -> (i32, i32) {
    %c0_i32 = arith.constant 0 : i32
    %c0_i32_0 = arith.constant 0 : i32
    %c0_i32_1 = arith.constant 0 : i32
    return %c0_i32, %c0_i32_0 : i32, i32
  }
  func.func @transform_6(%arg0: i32) -> (i32, i32) {
    %c0_i32 = arith.constant 0 : i32
    %c0_i32_0 = arith.constant 0 : i32
    %c0_i32_1 = arith.constant 0 : i32
    return %c0_i32, %c0_i32_0 : i32, i32
  }
  func.func @transform_7(%arg0: i32) -> (i32, i32) {
    %c0_i32 = arith.constant 0 : i32
    %c0_i32_0 = arith.constant 0 : i32
    %c0_i32_1 = arith.constant 0 : i32
    return %c0_i32, %c0_i32_0 : i32, i32
  }
  func.func @transform_8(%arg0: i32) -> (i32, i32, i32) {
    %c0_i32 = arith.constant 0 : i32
    %c0_i32_0 = arith.constant 0 : i32
    %c0_i32_1 = arith.constant 0 : i32
    return %arg0, %c0_i32, %c0_i32_0 : i32, i32, i32
  }
}

</mosaic_0001>

<bundles_post_ra>
// kernel: residual_block_forward.1
= control target key start
LH: loop header
LB: loop body
LE: loop exit
PB: predicated region body
PF: predicated region fallthrough
CT: control target
= control target key end

     0   :  { %s1285_s27 = smov 0   ;;  %s1492_s0 = inlined_call_operand.vmem [shape: f32[2,64,64], index: 0, kind: input, shape index: {}]   ;;  %s1493_s1 = inlined_call_operand.vmem [shape: f32[16,64], index: 1, kind: input, shape index: {}]   ;;  %s1494_s2 = inlined_call_operand.vmem [shape: f32[16,1], index: 2, kind: input, shape index: {}]   ;;  %s1495_s3 = inlined_call_operand.vmem [shape: f32[9,1,64], index: 3, kind: input, shape index: {}]   ;;  %s1496_s4 = inlined_call_operand.vmem [shape: f32[16,144], index: 4, kind: input, shape index: {}]   ;;  %s1497_s5 = inlined_call_operand.vmem [shape: f32[16,1], index: 5, kind: input, shape index: {}]   ;;  %s1498_s6 = inlined_call_operand.vmem [shape: f32[16,144], index: 6, kind: input, shape index: {}]   ;;  %s1499_s7 = inlined_call_operand.vmem [shape: f32[16,1], index: 7, kind: input, shape index: {}]   ;;  %s1500_s8 = inlined_call_operand.vmem [shape: f32[2,16,64], index: 8, kind: output, shape index: {}]  }
   0x1 LB: > { %s962_s28 = sadd.s32 4294967295, %s1220_s27   ;;  %p966_p0 = scmp.ge.s32.totalorder %s1220_s27, 1  ;;  %s1220_s27 = sphi %s1285_s27, %s18_s27  }
   0x2   : > { %p262_p1 = scmp.lt.s32.totalorder %s1220_s27, 3 }
   0x4   : > { %p263_p2 = pnand %p966_p0, %p262_p1 }
   0x5   : > { %p296_p3 = scmp.lt.s32.totalorder (!%p263_p2), %s962_s28, 1  ;;  %v306_v0 = vld [vmem:[%s1493_s1] sm:$0xff] (!%p263_p2)  ;;  %vm328_vm0 = vcmask (!%p263_p2), 523264   ;;  %v1222_v2 = vmov (!%p263_p2), 0   ;;  %v317_v3 = vld [vmem:[%s1494_s2 + $0x8] sm:$0xff] (!%p263_p2)  ;;  %s1223_s21 = smov (!%p263_p2), 1  }
   0x6   : > { %266 = sbr.rel (%p263_p2) target bundleno = 1295 (0x50f), region = 52  ;;  %v316_v1 = vld [vmem:[%s1494_s2] sm:$0xff] (!%p263_p2)  ;;  %1021 = vmatprep.mubr.msk.f32.mxu0 (!%p263_p2), %vm328_vm0, %v306_v0  ;;  %1120 = vset.pattern.permute.xlu0 (!%p263_p2), %v1222_v2  ;;  %v307_v16 = vld [vmem:[%s1493_s1 + $0x8] sm:$0xff] (!%p263_p2)  ;;  %s1224_s24 = smov (!%p263_p2), 8   ;;  %v1227_v35 = vmov (!%p263_p2), 0.0|0.0   ;;  %vm440_vm3 = vcmask (!%p263_p2), 72704  }
   0x7   : > { %320 = vperm.xlu0 (!%p263_p2), %1120, %v316_v1   ;;  %1161 = vset.pattern.permute.xlu1 (!%p263_p2), %v1222_v2  ;;  %v976_v17 = vld [vmem:[%s1495_s3 + $0x1] ss:$0 sm:$0xff] (!%p263_p2)  ;;  %v978_v18 = vld [vmem:[%s1495_s3 + $0x3] ss:$0 sm:$0xff] (!%p263_p2)  ;;  %v980_v19 = vld [vmem:[%s1495_s3 + $0x6] ss:$0 sm:$0xff] (!%p263_p2) }
   0x8   : > { %s1225_s29 = smov (!%p263_p2), 16   ;;  %v982_v20 = vld [vmem:[%s1495_s3 + $0x8] ss:$0 sm:$0xff] (!%p263_p2)  ;;  %s1226_s10 = smov (!%p263_p2), 18   ;;  %1040 = vmatprep.subr.bf16.mxu1 (!%p263_p2), %v1227_v35  ;;  %v977_v40 = vld [vmem:[%s1495_s3 + $0x2] ss:$0 sm:$0xff] (!%p263_p2) }
   0x9   : > { %s1228_s11 = smov (!%p263_p2), 9   ;;  %s1229_s14 = smov (!%p263_p2), 2   ;;  %v979_v41 = vld [vmem:[%s1495_s3 + $0x5] ss:$0 sm:$0xff] (!%p263_p2)  ;;  %v981_v42 = vld [vmem:[%s1495_s3 + $0x7] ss:$0 sm:$0xff] (!%p263_p2) }
   0xa   : > { %s1230_s17 = smov (!%p263_p2), 10   ;;  %s1231_s20 = smov (!%p263_p2), 17   ;;  %vm443_vm4 = vcmask (!%p263_p2), 596992   ;;  %v1355_v48 = vld [vmem:[%s1495_s3] ss:$0 sm:$0xff] (!%p263_p2)  ;;  %vm604_vm5 = vcmask (!%p263_p2), 130048  }
   0xb   : > { %325 = vperm.xlu0 (!%p263_p2), %1120, %v317_v3   ;;  %s1232_s23 = smov (!%p263_p2), 127   ;;  %s1234_s25 = smov (!%p263_p2), 120  }
   0xc   : > { %s1235_s26 = smov (!%p263_p2), 119   ;;  %s1237_s30 = smov (!%p263_p2), 112  }
   0xd   : > { %s1502_s28 = smov (!%p296_p3, %s962_s28), 1  ;;  %s1238_s9 = smov 111  }
   0xe   : > { %s993_s13 = sshll.u32 %s1502_s28, 6 }
   0xf   : > { %s300_s16 = scalar_lea.vmem %s1492_s0, %s993_s13  ;;  %459 = vrot.lane.b32.xlu0 %v976_v17, %s1223_s21 }
  0x10   : > { %v308_v4 = vld [vmem:[%s300_s16] sm:$0xff]  ;;  %v309_v5 = vld [vmem:[%s300_s16 + $0x8] sm:$0xff]  ;;  %v310_v6 = vld [vmem:[%s300_s16 + $0x10] sm:$0xff] }
  0x11   : > { %v1024_v7 = vpack.c.bf16 %v309_v5, %v308_v4  ;;  %v311_v8 = vld [vmem:[%s300_s16 + $0x18] sm:$0xff]  ;;  %v312_v10 = vld [vmem:[%s300_s16 + $0x20] sm:$0xff]  ;;  %v313_v11 = vld [vmem:[%s300_s16 + $0x28] sm:$0xff] }
  0x12   : > { %v1028_v9 = vpack.c.bf16 %v311_v8, %v310_v6  ;;  %v1032_v12 = vpack.c.bf16 %v313_v11, %v312_v10  ;;  %v314_v13 = vld [vmem:[%s300_s16 + $0x30] sm:$0xff]  ;;  %v315_v14 = vld [vmem:[%s300_s16 + $0x38] sm:$0xff]  ;;  %s994_s16 = sshll.u32 %s1502_s28, 4 }
  0x13   : > { %1025 = vmatprep.subr.bf16.mxu0 %v1024_v7  ;;  %v1036_v15 = vpack.c.bf16 %v315_v14, %v314_v13  ;;  %479 = vrot.lane.b32.xlu0 %v978_v18, %s1224_s24  ;;  %s1233_s24 = smov 126   ;;  %v593_v18 = vld [vmem:[%s1497_s5 + $0x8] sm:$0xff]  ;;  %s305_s19 = scalar_lea.vmem %s1500_s8, %s994_s16 }
  0x14   : > { %1027 = vmatpush3.bf16.msra.mxu0 %v1024_v7 }
  0x15   : > { %1029 = vmatprep.subr.bf16.mxu0 %v1028_v9 }
  0x17   : > { %499 = vrot.lane.b32.xlu0 %v980_v19, %s1225_s29  ;;  %s1236_s29 = smov 118   ;;  %v589_v19 = vld [vmem:[%s1496_s4 + $0x8] sm:$0xff] }
  0x18   : > { %1031 = vmatpush3.bf16.msra.mxu0 %v1028_v9  ;;  %983 = vmatprep.mubr.msk.f32.mxu1 %vm604_vm5, %v589_v19 }
  0x19   : > { %1033 = vmatprep.subr.bf16.mxu0 %v1032_v12 }
  0x1b   : > { %519 = vrot.lane.b32.xlu0 %v982_v20, %s1226_s10  ;;  %s1239_s10 = smov 110   ;;  %v592_v20 = vld [vmem:[%s1497_s5] sm:$0xff] }
  0x1c   : > { %1035 = vmatpush3.bf16.msra.mxu0 %v1032_v12 }
  0x1d   : > { %1037 = vmatprep.subr.bf16.mxu0 %v1036_v15 }
  0x20   : > { %1039 = vmatpush3.bf16.msra.mxu0 %v1036_v15 }
  0x21   : > { %1067 = vmatprep.subr.bf16.mxu0 %v1227_v35 }
  0x23   : > { %1022 = vmatmul.mubr.msk.f32.vlgmr.msra.gmra.mrb[0].mxu0 %vm328_vm0, %v307_v16 }
  0x86   : > { %v321_v21 = vpop.permute.xlu0 %320 }
  0x8a   : > { %v326_v22 = vpop.permute.xlu0 %325 }
  0x8e   : > { %v1348_v43 = vpop.permute.xlu0 %459 }
  0x92   : > { %v1358_v50 = vpop.permute.xlu0 %479 }
  0x96   : > { %v1372_v0 = vpop.permute.xlu0 %499 }
  0x9a   : > { %v1388_v12 = vpop.permute.xlu0 %519 }
  0xf6   : > { %v1023_v23 = vpop.f32.mrb[0].mxu0 }
  0xf7   : > { %v1325_v24 = vadd.f32 %v1023_v23, %v326_v22  ;;  %v401_v25 = vpop.f32.mrb[1].mxu0 }
  0xf8   : > { %v1327_v26 = vadd.f32 %v401_v25, %v321_v21 }
  0xf9   : > { %v414_v27 = vmul.f32 1.442695, %v1325_v24  ;;  %vm411_vm2 = vcmp.gt.f32.partialorder %v1325_v24, 0.0 }
  0xfa   : > { %v412_v28 = vmul.f32 1.442695, %v1327_v26  ;;  %vm410_vm1 = vcmp.gt.f32.partialorder %v1327_v26, 0.0 }
  0xfb   : > { %1202 = vpow2.f32 %v414_v27 }
  0xfc   : > { %1204 = vpow2.f32 %v412_v28 }
 0x105   : > { %v1203_v29 = vpop.eup %1202 }
 0x106   : > { %v1205_v30 = vpop.eup %1204  ;;  %v974_v31 = vadd.f32 -1.0, %v1203_v29 }
 0x107   : > { %v973_v32 = vadd.f32 -1.0, %v1205_v30 }
 0x108   : > { %v419_v34 = vmul.f32 1.6732632, %v974_v31 }
 0x109   : > { %v418_v33 = vmul.f32 1.6732632, %v973_v32 }
 0x10a   : > { %v421_v38 = vsel %vm411_vm2, %v1325_v24, %v419_v34 }
 0x10b   : > { %v420_v36 = vsel %vm410_vm1, %v1327_v26, %v418_v33  ;;  %v423_v39 = vmul.f32 1.050701, %v421_v38 }
 0x10c   : > { %v422_v37 = vmul.f32 1.050701, %v420_v36 }
 0x10e   : > { %434 = vrot.lane.b32.xlu1 %v422_v37, %s1228_s11 }
 0x112   : > { %436 = vrot.lane.b32.xlu1 %v423_v39, %s1228_s11 }
 0x116   : > { %469 = vrot.lane.b32.xlu1 %v977_v40, %s1229_s14 }
 0x11a   : > { %489 = vrot.lane.b32.xlu1 %v979_v41, %s1230_s17 }
 0x11e   : > { %509 = vrot.lane.b32.xlu1 %v981_v42, %s1231_s20 }
 0x180   : > { %v435_v44 = vpop.permute.xlu1 %434 }
 0x181   : > { %v441_v45 = vsel %vm440_vm3, 0.0, %v435_v44 }
 0x182   : > { %v444_v46 = vsel %vm443_vm4, %v441_v45, 0.0 }
 0x183   : > { %v462_v52 = vmul.f32 %v1348_v43, %v444_v46  ;;  %v452_v54 = vmul.f32 %v1355_v48, %v444_v46  ;;  %v482_v63 = vmul.f32 %v1358_v50, %v444_v46  ;;  %v502_v11 = vmul.f32 %v1372_v0, %v444_v46 }
 0x184   : > { %v437_v47 = vpop.permute.xlu1 %436  ;;  %v522_v15 = vmul.f32 %v1388_v12, %v444_v46 }
 0x185   : > { %v442_v49 = vsel %vm440_vm3, 0.0, %v437_v47 }
 0x186   : > { %v445_v51 = vsel %vm443_vm4, %v442_v49, 0.0 }
 0x187   : > { %v463_v53 = vmul.f32 %v1348_v43, %v445_v51  ;;  %v453_v55 = vmul.f32 %v1355_v48, %v445_v51  ;;  %v483_v57 = vmul.f32 %v1358_v50, %v445_v51  ;;  %v1136_v5 = vpack.i.bf16 %v445_v51, %v444_v46 }
 0x188   : > { %v1365_v56 = vpop.permute.xlu1 %469  ;;  %v503_v6 = vmul.f32 %v1372_v0, %v445_v51  ;;  %v523_v14 = vmul.f32 %v1388_v12, %v445_v51 }
 0x189   : > { %v472_v58 = vmul.f32 %v1365_v56, %v444_v46  ;;  %v473_v59 = vmul.f32 %v1365_v56, %v445_v51  ;;  %v1121_v60 = vpack.i.bf16 %v463_v53, %v462_v52  ;;  %v1041_v61 = vpack.c.bf16 %v453_v55, %v452_v54 }
 0x18a   : > { %v1131_v4 = vpack.i.bf16 %v483_v57, %v482_v63  ;;  %v1146_v13 = vpack.i.bf16 %v503_v6, %v502_v11  ;;  %v1156_v17 = vpack.i.bf16 %v523_v14, %v522_v15 }
 0x18b   : > { %1122 = vrot.lane.b32.xlu1 %v1121_v60, %s1232_s23  ;;  %1042 = vmatpush1.bf16.msra.mxu1 %v1041_v61  ;;  %v1126_v62 = vpack.i.bf16 %v473_v59, %v472_v58  ;;  %v588_v60 = vld [vmem:[%s1496_s4] sm:$0xff]  ;;  %v591_v61 = vld [vmem:[%s1496_s4 + $0x18] sm:$0xff] }
 0x18c   : > { %v1374_v1 = vpop.permute.xlu1 %489  ;;  %1043 = vmatprep.subr.bf16.mxu1 %v1227_v35 }
 0x18d   : > { %v492_v2 = vmul.f32 %v1374_v1, %v444_v46  ;;  %v493_v3 = vmul.f32 %v1374_v1, %v445_v51  ;;  %1127 = vrot.lane.b32.xlu0 %v1126_v62, %s1233_s24  ;;  %v590_v62 = vld [vmem:[%s1496_s4 + $0x10] sm:$0xff] }
 0x18f   : > { %1132 = vrot.lane.b32.xlu1 %v1131_v4, %s1234_s25  ;;  %v1141_v10 = vpack.i.bf16 %v493_v3, %v492_v2 }
 0x190   : > { %v1382_v7 = vpop.permute.xlu1 %509 }
 0x191   : > { %v512_v8 = vmul.f32 %v1382_v7, %v444_v46  ;;  %v513_v9 = vmul.f32 %v1382_v7, %v445_v51  ;;  %1137 = vrot.lane.b32.xlu0 %v1136_v5, %s1235_s26 }
 0x193   : > { %1142 = vrot.lane.b32.xlu1 %v1141_v10, %s1236_s29  ;;  %v1151_v16 = vpack.i.bf16 %v513_v9, %v512_v8 }
 0x195   : > { %1147 = vrot.lane.b32.xlu0 %v1146_v13, %s1237_s30 }
 0x197   : > { %1152 = vrot.lane.b32.xlu1 %v1151_v16, %s1238_s9 }
 0x199   : > { %1157 = vrot.lane.b32.xlu0 %v1156_v17, %s1239_s10 }
 0x19b   : > { %596 = vperm.xlu1 %1161, %v592_v20  }
 0x19d   : > { %601 = vperm.xlu0 %1120, %v593_v18  }
 0x1fd   : > { %v1123_v21 = vpop.permute.xlu1 %1122 }
 0x1fe   : > { %v1125_v22 = vunpack.i.h.bf16 %v1123_v21  ;;  %v1124_v23 = vunpack.i.l.bf16 %v1123_v21 }
 0x1ff   : > { %v1128_v25 = vpop.permute.xlu0 %1127 }
 0x200   : > { %v1044_v27 = vpack.c.bf16 %v1125_v22, %v1124_v23  ;;  %v1130_v28 = vunpack.i.h.bf16 %v1128_v25  ;;  %v1129_v29 = vunpack.i.l.bf16 %v1128_v25 }
 0x201   : > { %v1133_v30 = vpop.permute.xlu1 %1132 }
 0x202   : > { %1045 = vmatpush1.bf16.msra.mxu1 %v1044_v27  ;;  %v1047_v31 = vpack.c.bf16 %v1130_v28, %v1129_v29  ;;  %v1135_v32 = vunpack.i.h.bf16 %v1133_v30  ;;  %v1134_v33 = vunpack.i.l.bf16 %v1133_v30 }
 0x203   : > { %1046 = vmatprep.subr.bf16.mxu1 %v1227_v35  ;;  %v1138_v34 = vpop.permute.xlu0 %1137 }
 0x204   : > { %v1050_v36 = vpack.c.bf16 %v1135_v32, %v1134_v33  ;;  %v1140_v37 = vunpack.i.h.bf16 %v1138_v34  ;;  %v1139_v38 = vunpack.i.l.bf16 %v1138_v34 }
 0x205   : > { %v1143_v39 = vpop.permute.xlu1 %1142 }
 0x206   : > { %1048 = vmatpush1.bf16.msra.mxu1 %v1047_v31  ;;  %v1053_v40 = vpack.c.bf16 %v1140_v37, %v1139_v38  ;;  %v1145_v41 = vunpack.i.h.bf16 %v1143_v39  ;;  %v1144_v42 = vunpack.i.l.bf16 %v1143_v39 }
 0x207   : > { %1049 = vmatprep.subr.bf16.mxu1 %v1227_v35  ;;  %v1148_v44 = vpop.permute.xlu0 %1147 }
 0x208   : > { %v1056_v45 = vpack.c.bf16 %v1145_v41, %v1144_v42  ;;  %v1150_v46 = vunpack.i.h.bf16 %v1148_v44  ;;  %v1149_v47 = vunpack.i.l.bf16 %v1148_v44 }
 0x209   : > { %v1153_v49 = vpop.permute.xlu1 %1152 }
 0x20a   : > { %1051 = vmatpush1.bf16.msra.mxu1 %v1050_v36  ;;  %v1059_v51 = vpack.c.bf16 %v1150_v46, %v1149_v47  ;;  %v1155_v52 = vunpack.i.h.bf16 %v1153_v49  ;;  %v1154_v53 = vunpack.i.l.bf16 %v1153_v49 }
 0x20b   : > { %1052 = vmatprep.subr.bf16.mxu1 %v1227_v35  ;;  %v1158_v54 = vpop.permute.xlu0 %1157 }
 0x20c   : > { %v1062_v55 = vpack.c.bf16 %v1155_v52, %v1154_v53  ;;  %v1160_v57 = vunpack.i.h.bf16 %v1158_v54  ;;  %v1159_v58 = vunpack.i.l.bf16 %v1158_v54 }
 0x20e   : > { %1054 = vmatpush1.bf16.msra.mxu1 %v1053_v40  ;;  %v1065_v59 = vpack.c.bf16 %v1160_v57, %v1159_v58 }
 0x20f   : > { %1055 = vmatprep.subr.bf16.mxu1 %v1227_v35 }
 0x212   : > { %1057 = vmatpush1.bf16.msra.mxu1 %v1056_v45 }
 0x213   : > { %1058 = vmatprep.subr.bf16.mxu1 %v1227_v35 }
 0x216   : > { %1060 = vmatpush1.bf16.msra.mxu1 %v1059_v51 }
 0x217   : > { %1061 = vmatprep.subr.bf16.mxu1 %v1227_v35 }
 0x21a   : > { %1063 = vmatpush1.bf16.msra.mxu1 %v1062_v55  ;;  %v597_v63 = vpop.permute.xlu1 %596 }
 0x21b   : > { %1064 = vmatprep.subr.bf16.mxu1 %v1227_v35 }
 0x21c   : > { %v602_v6 = vpop.permute.xlu0 %601 }
 0x21e   : > { %1066 = vmatpush1.bf16.msra.mxu1 %v1065_v59 }
 0x221   : > { %676 = vmatmul.mubr.f32.vlgmr.msra.gmra.mrb[0].mxu1 %v588_v60 }
 0x222   : > { %984 = vmatprep.mubr.msk.f32.mxu1 %vm604_vm5, %v591_v61 }
 0x225   : > { %681 = vmatmul.mubr.f32.gmra.mrb[2].mxu1 %v590_v62 }
 0x2f4   : > { %v677_v2 = vpop.f32.mrb[0].mxu1 }
 0x2f5   : > { %v678_v3 = vadd.f32 %v677_v2, %v597_v63  ;;  %v679_v4 = vpop.f32.mrb[1].mxu1 }
 0x2f7   : > { %v688_v5 = vmul.f32 1.442695, %v678_v3  ;;  %vm686_vm6 = vcmp.gt.f32.partialorder %v678_v3, 0.0 }
 0x2f8   : > { %v682_v8 = vpop.f32.mrb[2].mxu1 }
 0x2f9   : > { %1206 = vpow2.f32 %v688_v5  ;;  %v683_v9 = vadd.f32 %v682_v8, %v602_v6  ;;  %v684_v10 = vpop.f32.mrb[3].mxu1 }
 0x2fb   : > { %v690_v11 = vmul.f32 1.442695, %v683_v9  ;;  %vm687_vm7 = vcmp.gt.f32.partialorder %v683_v9, 0.0 }
 0x2fd   : > { %1208 = vpow2.f32 %v690_v11 }
 0x303   : > { %v1207_v13 = vpop.eup %1206 }
 0x304   : > { %v985_v14 = vadd.f32 -1.0, %v1207_v13 }
 0x306   : > { %v694_v15 = vmul.f32 1.6732632, %v985_v14 }
 0x307   : > { %v1209_v16 = vpop.eup %1208 }
 0x308   : > { %v986_v17 = vadd.f32 -1.0, %v1209_v16  ;;  %v696_v18 = vsel %vm686_vm6, %v678_v3, %v694_v15 }
 0x309   : > { %v698_v19 = vmul.f32 1.050701, %v696_v18 }
 0x30a   : > { %v695_v20 = vmul.f32 1.6732632, %v986_v17 }
 0x30b   : > { %702 = vrot.lane.b32.xlu1 %v698_v19, %s1228_s11 }
 0x30c   : > { %v697_v21 = vsel %vm687_vm7, %v683_v9, %v695_v20 }
 0x30d   : > { %v699_v22 = vmul.f32 1.050701, %v697_v21 }
 0x30f   : > { %704 = vrot.lane.b32.xlu0 %v699_v22, %s1228_s11 }
 0x37d   : > { %v703_v23 = vpop.permute.xlu1 %702 }
 0x37e   : > { %v708_v25 = vsel %vm440_vm3, 0.0, %v703_v23 }
 0x37f   : > { %v710_v27 = vsel %vm443_vm4, %v708_v25, 0.0 }
 0x380   : > { %v716_v31 = vmul.f32 %v710_v27, %v1365_v56  ;;  %v714_v32 = vmul.f32 %v710_v27, %v1348_v43  ;;  %v712_v36 = vmul.f32 %v1355_v48, %v710_v27  ;;  %v718_v42 = vmul.f32 %v710_v27, %v1358_v50 }
 0x381   : > { %v705_v28 = vpop.permute.xlu0 %704  ;;  %v720_v46 = vmul.f32 %v710_v27, %v1374_v1  ;;  %v726_v52 = vmul.f32 %v710_v27, %v1388_v12  ;;  %v724_v53 = vmul.f32 %v710_v27, %v1382_v7 }
 0x382   : > { %v709_v29 = vsel %vm440_vm3, 0.0, %v705_v28 }
 0x383   : > { %v711_v30 = vsel %vm443_vm4, %v709_v29, 0.0 }
 0x384   : > { %v717_v33 = vmul.f32 %v711_v30, %v1365_v56  ;;  %v715_v34 = vmul.f32 %v711_v30, %v1348_v43  ;;  %v713_v37 = vmul.f32 %v1355_v48, %v711_v30  ;;  %v719_v41 = vmul.f32 %v711_v30, %v1358_v50 }
 0x385   : > { %v1177_v44 = vpack.i.bf16 %v711_v30, %v710_v27  ;;  %v723_v43 = vmul.f32 %v711_v30, %v1372_v0  ;;  %v721_v45 = vmul.f32 %v711_v30, %v1374_v1  ;;  %v722_v48 = vmul.f32 %v710_v27, %v1372_v0  ;;  %v797_v0 = vld [vmem:[%s1499_s7 + $0x8] sm:$0xff]  ;;  %v796_v1 = vld [vmem:[%s1499_s7] sm:$0xff] }
 0x386   : > { %v1167_v38 = vpack.i.bf16 %v717_v33, %v716_v31  ;;  %v1162_v39 = vpack.i.bf16 %v715_v34, %v714_v32  ;;  %v1068_v40 = vpack.c.bf16 %v713_v37, %v712_v36  ;;  %v1172_v56 = vpack.i.bf16 %v719_v41, %v718_v42  ;;  %v795_v31 = vld [vmem:[%s1498_s6 + $0x18] sm:$0xff]  ;;  %v794_v32 = vld [vmem:[%s1498_s6 + $0x10] sm:$0xff] }
 0x387   : > { %v1187_v47 = vpack.i.bf16 %v723_v43, %v722_v48  ;;  %v1182_v49 = vpack.i.bf16 %v721_v45, %v720_v46  ;;  %v727_v50 = vmul.f32 %v711_v30, %v1388_v12  ;;  %v725_v51 = vmul.f32 %v711_v30, %v1382_v7  ;;  %v793_v7 = vld [vmem:[%s1498_s6 + $0x8] sm:$0xff]  ;;  %v792_v30 = vld [vmem:[%s1498_s6] sm:$0xff] }
 0x388   : > { %1168 = vrot.lane.b32.xlu0 %v1167_v38, %s1233_s24  ;;  %1163 = vrot.lane.b32.xlu1 %v1162_v39, %s1232_s23 }
 0x389   : > { %1069 = vmatpush1.bf16.msra.mxu0 %v1068_v40  ;;  %v1197_v54 = vpack.i.bf16 %v727_v50, %v726_v52  ;;  %v1192_v55 = vpack.i.bf16 %v725_v51, %v724_v53  ;;  %987 = vmatprep.mubr.msk.f32.mxu0 %vm604_vm5, %v793_v7 }
 0x38a   : > { %1070 = vmatprep.subr.bf16.mxu0 %v1227_v35 }
 0x38c   : > { %1178 = vrot.lane.b32.xlu0 %v1177_v44, %s1235_s26  ;;  %1173 = vrot.lane.b32.xlu1 %v1172_v56, %s1234_s25 }
 0x390   : > { %1188 = vrot.lane.b32.xlu0 %v1187_v47, %s1237_s30  ;;  %1183 = vrot.lane.b32.xlu1 %v1182_v49, %s1236_s29 }
 0x394   : > { %1198 = vrot.lane.b32.xlu0 %v1197_v54, %s1239_s10  ;;  %1193 = vrot.lane.b32.xlu1 %v1192_v55, %s1238_s9 }
 0x398   : > { %805 = vperm.xlu0 %1120, %v797_v0   ;;  %800 = vperm.xlu1 %1161, %v796_v1  }
 0x3fa   : > { %v1169_v12 = vpop.permute.xlu0 %1168  ;;  %v1164_v57 = vpop.permute.xlu1 %1163 }
 0x3fb   : > { %v1166_v58 = vunpack.i.h.bf16 %v1164_v57  ;;  %v1165_v59 = vunpack.i.l.bf16 %v1164_v57  ;;  %v1171_v60 = vunpack.i.h.bf16 %v1169_v12  ;;  %v1170_v61 = vunpack.i.l.bf16 %v1169_v12 }
 0x3fd   : > { %v1071_v62 = vpack.c.bf16 %v1166_v58, %v1165_v59  ;;  %v1074_v2 = vpack.c.bf16 %v1171_v60, %v1170_v61 }
 0x3fe   : > { %v1174_v63 = vpop.permute.xlu1 %1173  ;;  %v1179_v5 = vpop.permute.xlu0 %1178 }
 0x3ff   : > { %1072 = vmatpush1.bf16.msra.mxu0 %v1071_v62  ;;  %v1176_v3 = vunpack.i.h.bf16 %v1174_v63  ;;  %v1175_v4 = vunpack.i.l.bf16 %v1174_v63  ;;  %v1181_v6 = vunpack.i.h.bf16 %v1179_v5  ;;  %v1180_v8 = vunpack.i.l.bf16 %v1179_v5 }
 0x400   : > { %1073 = vmatprep.subr.bf16.mxu0 %v1227_v35 }
 0x401   : > { %v1077_v9 = vpack.c.bf16 %v1176_v3, %v1175_v4  ;;  %v1080_v11 = vpack.c.bf16 %v1181_v6, %v1180_v8 }
 0x402   : > { %v1184_v10 = vpop.permute.xlu1 %1183  ;;  %v1189_v15 = vpop.permute.xlu0 %1188 }
 0x403   : > { %1075 = vmatpush1.bf16.msra.mxu0 %v1074_v2  ;;  %v1186_v13 = vunpack.i.h.bf16 %v1184_v10  ;;  %v1185_v14 = vunpack.i.l.bf16 %v1184_v10  ;;  %v1191_v16 = vunpack.i.h.bf16 %v1189_v15  ;;  %v1190_v17 = vunpack.i.l.bf16 %v1189_v15 }
 0x404   : > { %1076 = vmatprep.subr.bf16.mxu0 %v1227_v35 }
 0x405   : > { %v1083_v18 = vpack.c.bf16 %v1186_v13, %v1185_v14  ;;  %v1086_v20 = vpack.c.bf16 %v1191_v16, %v1190_v17 }
 0x406   : > { %v1194_v19 = vpop.permute.xlu1 %1193  ;;  %v1199_v23 = vpop.permute.xlu0 %1198 }
 0x407   : > { %1078 = vmatpush1.bf16.msra.mxu0 %v1077_v9  ;;  %v1196_v21 = vunpack.i.h.bf16 %v1194_v19  ;;  %v1195_v22 = vunpack.i.l.bf16 %v1194_v19  ;;  %v1201_v25 = vunpack.i.h.bf16 %v1199_v23  ;;  %v1200_v27 = vunpack.i.l.bf16 %v1199_v23 }
 0x408   : > { %1079 = vmatprep.subr.bf16.mxu0 %v1227_v35 }
 0x409   : > { %v1089_v28 = vpack.c.bf16 %v1196_v21, %v1195_v22  ;;  %v1092_v29 = vpack.c.bf16 %v1201_v25, %v1200_v27 }
 0x40b   : > { %1081 = vmatpush1.bf16.msra.mxu0 %v1080_v11 }
 0x40c   : > { %1082 = vmatprep.subr.bf16.mxu0 %v1227_v35 }
 0x40f   : > { %1084 = vmatpush1.bf16.msra.mxu0 %v1083_v18 }
 0x410   : > { %1085 = vmatprep.subr.bf16.mxu0 %v1227_v35 }
 0x413   : > { %1087 = vmatpush1.bf16.msra.mxu0 %v1086_v20 }
 0x414   : > { %1088 = vmatprep.subr.bf16.mxu0 %v1227_v35 }
 0x417   : > { %1090 = vmatpush1.bf16.msra.mxu0 %v1089_v28  ;;  %v801_v33 = vpop.permute.xlu1 %800  ;;  %v806_v38 = vpop.permute.xlu0 %805 }
 0x418   : > { %1091 = vmatprep.subr.bf16.mxu0 %v1227_v35 }
 0x41b   : > { %1093 = vmatpush1.bf16.msra.mxu0 %v1092_v29 }
 0x41e   : > { %879 = vmatmul.mubr.f32.vlgmr.msra.gmra.mrb[2].mxu0 %v792_v30 }
 0x41f   : > { %988 = vmatprep.mubr.msk.f32.mxu0 %vm604_vm5, %v795_v31 }
 0x422   : > { %884 = vmatmul.mubr.f32.gmra.mrb[4].mxu0 %v794_v32 }
 0x4f1   : > { %v880_v35 = vpop.f32.mrb[2].mxu0 }
 0x4f2   : > { %v881_v34 = vadd.f32 %v880_v35, %v801_v33  ;;  %v882_v36 = vpop.f32.mrb[3].mxu0 }
 0x4f4   : > { %v891_v37 = vmul.f32 1.442695, %v881_v34  ;;  %vm889_vm8 = vcmp.gt.f32.partialorder %v881_v34, 0.0 }
 0x4f5   : > { %v885_v39 = vpop.f32.mrb[4].mxu0 }
 0x4f6   : > { %1210 = vpow2.f32 %v891_v37  ;;  %v886_v40 = vadd.f32 %v885_v39, %v806_v38  ;;  %v887_v41 = vpop.f32.mrb[5].mxu0 }
 0x4f8   : > { %v893_v42 = vmul.f32 1.442695, %v886_v40  ;;  %vm890_vm9 = vcmp.gt.f32.partialorder %v886_v40, 0.0 }
 0x4fa   : > { %1212 = vpow2.f32 %v893_v42 }
 0x500   : > { %v1211_v44 = vpop.eup %1210 }
 0x501   : > { %v989_v56 = vadd.f32 -1.0, %v1211_v44 }
 0x503   : > { %v897_v43 = vmul.f32 1.6732632, %v989_v56 }
 0x504   : > { %v1213_v45 = vpop.eup %1212 }
 0x505   : > { %v899_v48 = vsel %vm889_vm8, %v881_v34, %v897_v43  ;;  %v990_v46 = vadd.f32 -1.0, %v1213_v45 }
 0x506   : > { %v901_v47 = vmul.f32 1.050701, %v899_v48 }
 0x507   : > { %v898_v49 = vmul.f32 1.6732632, %v990_v46 }
 0x508   : > { %v903_v50 = vadd.f32 %v901_v47, %v1327_v26 }
 0x509   : > { %v900_v51 = vsel %vm890_vm9, %v886_v40, %v898_v49 }
 0x50a   : > { %905 = vst.msk [vmem:[%s305_s19] sm:$0xff] %vm328_vm0, %v903_v50  ;;  %v902_v52 = vmul.f32 1.050701, %v900_v51 }
 0x50c   : > { %v904_v53 = vadd.f32 %v902_v52, %v1325_v24 }
 0x50e   : > { %906 = vst.msk [vmem:[%s305_s19 + $0x8] sm:$0xff] %vm328_vm0, %v904_v53 }
 0x50f PF: > { %s18_s27 = sadd.s32 1, %s1220_s27  }
 0x510   : > { %p15_p4 = scmp.ge.s32.totalorder %s18_s27, 4  }
 0x512   :  { %17 = sbr.rel (!%p15_p4) target bundleno = 1 (0x1), region = 82 }

</bundles_post_ra>
